<compile_context>
chip_gen: v7x
topology: tpu7x:2x2x1
jax: 0.10.0
libtpu: 0.0.40
codegen_flags: <defaults>
</compile_context>

<pallas_src>
import functools

import jax
import jax.numpy as jnp
from jax.experimental import pallas as pl
from jax.experimental.pallas import tpu as pltpu


def _round_up(n, m):
    return ((n + m - 1) // m) * m


def _vmem_capacity_bytes():
    """Per-core VMEM capacity; falls back to the v7x 64 MiB floor if the query fails."""
    try:
        cap = int(pltpu.get_tpu_info().vmem_capacity_bytes)
        if cap > 0:
            return cap
    except Exception:
        pass
    return 64 * 1024 * 1024


def _activation_dtype(x_dtype, w_dtype):
    """bf16 bias-add/tanh only when operands are bf16 AND the chip has bf16 VPU/EUP (v6e/v7x)."""
    if (jnp.dtype(x_dtype) != jnp.dtype(jnp.bfloat16)
            or jnp.dtype(w_dtype) != jnp.dtype(jnp.bfloat16)):
        return jnp.float32
    try:
        kind = jax.devices()[0].device_kind.lower()
    except Exception:
        return jnp.float32
    if ("v6" in kind) or ("v7" in kind):
        return jnp.bfloat16
    return jnp.float32  # v5e and older: no bf16 VPU/EUP


def _shallownn_kernel_reduce(x_ref, w1_ref, b1_ref, w2t_ref, o_ref, *, act_dtype):
    """out_dim == 1: second layer as VPU multiply + lane reduction (no 1-column MXU matmul)."""
    h = jnp.dot(x_ref[...], w1_ref[...], preferred_element_type=jnp.float32)   # MXU, f32 acc
    h = h.astype(act_dtype) + b1_ref[...].astype(act_dtype)                    # VPU
    h = jnp.tanh(h)                                                            # EUP
    w2_row = w2t_ref[...].astype(act_dtype)                                    # (1, width_p)
    y = jnp.sum((h * w2_row).astype(jnp.float32), axis=-1, keepdims=True)      # VPU mul + XLU reduce
    o_ref[...] = y.astype(o_ref.dtype)


def _shallownn_kernel_dot(x_ref, w1_ref, b1_ref, w2_ref, o_ref, *, act_dtype):
    """General out_dim: both layers on the MXU, f32 accumulation."""
    h = jnp.dot(x_ref[...], w1_ref[...], preferred_element_type=jnp.float32)
    h = h.astype(act_dtype) + b1_ref[...].astype(act_dtype)
    h = jnp.tanh(h)
    y = jnp.dot(h.astype(w2_ref.dtype), w2_ref[...], preferred_element_type=jnp.float32)
    o_ref[...] = y.astype(o_ref.dtype)


def shallownn_forward(x, w1, b1, w2, *, block_b=None, out_dtype=None):
    """x:(B,in_dim), w1:(in_dim,width), b1:(1,width), w2:(width,out_dim) -> (B,out_dim)."""
    B, in_dim = x.shape
    width = w1.shape[1]
    out_dim = w2.shape[1]
    if out_dtype is None:
        out_dtype = x.dtype
    act_dtype = _activation_dtype(x.dtype, w1.dtype)

    # --- pad the hidden width to a lane-dense multiple of 128 (zero pad => numerically inert)
    width_p = _round_up(width, 128)
    if width_p != width:
        w1 = jnp.pad(w1, ((0, 0), (0, width_p - width)))
        b1 = jnp.pad(b1, ((0, 0), (0, width_p - width)))
        w2 = jnp.pad(w2, ((0, width_p - width), (0, 0)))

    # --- size the batch tile from the per-generation VMEM budget
    pack = 16 if jnp.dtype(x.dtype).itemsize == 2 else 8      # sublane packing of the batch dim
    x_it = jnp.dtype(x.dtype).itemsize
    w_it = jnp.dtype(w1.dtype).itemsize
    o_it = jnp.dtype(out_dtype).itemsize
    act_it = jnp.dtype(act_dtype).itemsize

    cap = _vmem_capacity_bytes()
    vmem_target = int(0.8 * cap)

    weights_bytes = (in_dim * width_p + width_p + width_p * out_dim) * w_it   # single-buffered
    per_row = (2 * in_dim * x_it            # double-buffered x tile
               + 2 * out_dim * o_it         # double-buffered out tile
               + width_p * (4 + act_it)     # f32 matmul-1 result + activation copy
               + 4 * out_dim)               # f32 matmul-2 result

    if block_b is None:
        budget = max(per_row * pack, vmem_target - weights_bytes - (4 << 20))
        tb_budget = max(pack, ((budget // per_row) // pack) * pack)
        # keep >= 4 tiles when B is large so v7x's 2 TCs (dimension_semantics parallel)
        # both get work; neutral on single-TC v5e/v6e.
        tb = min(tb_budget, _round_up(pl.cdiv(B, 4), pack), 8192)
        tb = max(pack, tb)
    else:
        tb = _round_up(max(1, min(block_b, B)), pack)

    grid = (pl.cdiv(B, tb),)   # partial last tile handled by Pallas masking (no x pad pass)

    need = weights_bytes + tb * per_row + (4 << 20)
    vmem_limit_bytes = int(min(max(need, 32 << 20), int(0.8 * cap)))

    if out_dim == 1:
        kernel = functools.partial(_shallownn_kernel_reduce, act_dtype=act_dtype)
        w2_arg = w2.T                                            # (1, width_p) lane-dense row
        w2_spec = pl.BlockSpec((1, width_p), lambda i: (0, 0),
                               pipeline_mode=pl.Buffered(1))
    else:
        kernel = functools.partial(_shallownn_kernel_dot, act_dtype=act_dtype)
        w2_arg = w2
        w2_spec = pl.BlockSpec((width_p, out_dim), lambda i: (0, 0),
                               pipeline_mode=pl.Buffered(1))

    grid_spec = pltpu.PrefetchScalarGridSpec(
        num_scalar_prefetch=0,
        grid=grid,
        in_specs=[
            pl.BlockSpec((tb, in_dim), lambda i: (i, 0)),                 # streamed, double-buffered
            pl.BlockSpec((in_dim, width_p), lambda i: (0, 0),             # resident, single-buffered
                         pipeline_mode=pl.Buffered(1)),
            pl.BlockSpec((1, width_p), lambda i: (0, 0),                  # resident, single-buffered
                         pipeline_mode=pl.Buffered(1)),
            w2_spec,                                                      # resident, single-buffered
        ],
        out_specs=pl.BlockSpec((tb, out_dim), lambda i: (i, 0)),
    )

    return pl.pallas_call(
        kernel,
        out_shape=jax.ShapeDtypeStruct((B, out_dim), out_dtype),
        grid_spec=grid_spec,
        compiler_params=pltpu.CompilerParams(
            dimension_semantics=("parallel",),        # v7x: shard batch tiles across the 2 TCs
            vmem_limit_bytes=vmem_limit_bytes),
    )(x, w1, b1, w2_arg)


def init_params(key, in_dim, width, out_dim, dtype=jnp.float32):
    """torch.nn.Linear-style init U(-1/sqrt(fan_in), 1/sqrt(fan_in)), stored pre-transposed."""
    k1, k2, k3 = jax.random.split(key, 3)
    bound1 = 1.0 / (in_dim ** 0.5)
    bound2 = 1.0 / (width ** 0.5)
    w1 = jax.random.uniform(k1, (in_dim, width), jnp.float32, -bound1, bound1).astype(dtype)
    b1 = jax.random.uniform(k2, (1, width), jnp.float32, -bound1, bound1).astype(dtype)
    w2 = jax.random.uniform(k3, (width, out_dim), jnp.float32, -bound2, bound2).astype(dtype)
    return w1, b1, w2


if __name__ == "__main__":
    key = jax.random.PRNGKey(0)
    k1, k2, k3, k4, k5 = jax.random.split(key, 5)

    # ---- test 1: small f32 problem, out_dim == 1 (VPU/XLU reduce path) -----------------
    B, in_dim, width, out_dim = 8, 16, 32, 1
    x = jax.random.normal(k1, (B, in_dim), jnp.float32)
    w1, b1, w2 = init_params(k2, in_dim, width, out_dim, dtype=jnp.float32)
    out = jax.block_until_ready(shallownn_forward(x, w1, b1, w2, out_dtype=jnp.float32))
    ref = jnp.tanh(x @ w1 + b1) @ w2
    assert out.shape == (B, out_dim)
    assert jnp.allclose(out, ref, atol=1e-2, rtol=1e-2)

    # ---- test 2: bf16 operands, out_dim > 1 (general MXU path, bf16 act on v6e/v7x) ----
    B2, out_dim2 = 16, 4
    x16 = jax.random.normal(k3, (B2, in_dim), jnp.float32).astype(jnp.bfloat16)
    w1b, b1b, w2b = init_params(k4, in_dim, width, out_dim2, dtype=jnp.bfloat16)
    out2 = jax.block_until_ready(shallownn_forward(x16, w1b, b1b, w2b, out_dtype=jnp.float32))
    # reference mirrors the kernel's activation-dtype path (f32 on v5e, bf16 on v6e/v7x)
    act_dt = _activation_dtype(x16.dtype, w1b.dtype)
    xf, w1f, b1f, w2f = (a.astype(jnp.float32) for a in (x16, w1b, b1b, w2b))
    h_pre = (xf @ w1f + b1f).astype(act_dt).astype(jnp.float32)
    h_ref = jnp.tanh(h_pre).astype(act_dt).astype(jnp.float32)
    ref2 = h_ref @ w2f
    assert out2.shape == (B2, out_dim2)
    assert jnp.allclose(out2, ref2, atol=3e-2, rtol=3e-2)

    # ---- test 3: non-divisible batch + multiple tiles (partial last tile, no x pad) ----
    B3 = 70
    x3 = jax.random.normal(k5, (B3, in_dim), jnp.float32)
    out3 = jax.block_until_ready(
        shallownn_forward(x3, w1, b1, w2, block_b=32, out_dtype=jnp.float32))
    ref3 = jnp.tanh(x3 @ w1 + b1) @ w2
    assert out3.shape == (B3, out_dim)
    assert jnp.allclose(out3, ref3, atol=1e-2, rtol=1e-2)

    print("KERNEL_OK")
</pallas_src>

<mosaic_0001>
module attributes {stable_mosaic.version = 11 : i64} {
  func.func @_shallownn_kernel_reduce(%arg0: i32, %arg1: memref<8x16xf32, #tpu.memory_space<vmem>>, %arg2: memref<16x128xf32, #tpu.memory_space<vmem>>, %arg3: memref<1x128xf32, #tpu.memory_space<vmem>>, %arg4: memref<1x128xf32, #tpu.memory_space<vmem>>, %arg5: memref<8x1xf32, #tpu.memory_space<vmem>>) attributes {dimension_semantics = [#tpu.dimension_semantics<parallel>], iteration_bounds = array<i64: 1>, scalar_prefetch = 0 : i64, scratch_operands = 0 : i64, tpu.core_type = #tpu.core_type<tc>, window_params = [{transform_indices = @transform_0, window_bounds = array<i64: 8, 16>}, {pipeline_mode = #tpu.pipeline_mode<synchronous>, transform_indices = @transform_1, window_bounds = array<i64: 16, 128>}, {pipeline_mode = #tpu.pipeline_mode<synchronous>, transform_indices = @transform_2, window_bounds = array<i64: 1, 128>}, {pipeline_mode = #tpu.pipeline_mode<synchronous>, transform_indices = @transform_3, window_bounds = array<i64: 1, 128>}, {transform_indices = @transform_4, window_bounds = array<i64: 8, 1>}]} {
    %c0 = arith.constant 0 : index
    %c0_0 = arith.constant 0 : index
    %0 = vector.load %arg1[%c0, %c0_0] : memref<8x16xf32, #tpu.memory_space<vmem>>, vector<8x16xf32>
    %c0_1 = arith.constant 0 : index
    %c0_2 = arith.constant 0 : index
    %1 = vector.load %arg2[%c0_1, %c0_2] : memref<16x128xf32, #tpu.memory_space<vmem>>, vector<16x128xf32>
    %cst = arith.constant dense<0.000000e+00> : vector<8x128xf32>
    %2 = tpu.matmul %0, %1, %cst {dimension_numbers = #tpu.dot_dimension_numbers<[1], [0], [0], [1], [0, 0, 1, 1], [], []>} : vector<8x16xf32>, vector<16x128xf32>, vector<8x128xf32> -> vector<8x128xf32>
    %c0_3 = arith.constant 0 : index
    %c0_4 = arith.constant 0 : index
    %3 = vector.load %arg3[%c0_3, %c0_4] : memref<1x128xf32, #tpu.memory_space<vmem>>, vector<1x128xf32>
    %4 = vector.broadcast %3 : vector<1x128xf32> to vector<8x128xf32>
    %5 = arith.addf %2, %4 : vector<8x128xf32>
    %6 = math.tanh %5 : vector<8x128xf32>
    %c0_5 = arith.constant 0 : index
    %c0_6 = arith.constant 0 : index
    %7 = vector.load %arg4[%c0_5, %c0_6] : memref<1x128xf32, #tpu.memory_space<vmem>>, vector<1x128xf32>
    %8 = vector.broadcast %7 : vector<1x128xf32> to vector<8x128xf32>
    %9 = arith.mulf %6, %8 : vector<8x128xf32>
    %cst_7 = arith.constant dense<0.000000e+00> : vector<8xf32>
    %10 = vector.multi_reduction <add>, %9, %cst_7 [1] : vector<8x128xf32> to vector<8xf32>
    %11 = vector.shape_cast %10 : vector<8xf32> to vector<8x1xf32>
    %c0_8 = arith.constant 0 : index
    %c0_9 = arith.constant 0 : index
    %12 = vector.load %arg5[%c0_8, %c0_9] : memref<8x1xf32, #tpu.memory_space<vmem>>, vector<8x1xf32>
    tpu.vector_store %arg5[%c0_8, %c0_9], %11 {strides = array<i32>} : memref<8x1xf32, #tpu.memory_space<vmem>>, vector<8x1xf32>,
    return
  }
  func.func @transform_0(%arg0: i32) -> (i32, i32) {
    %c0_i32 = arith.constant 0 : i32
    %c0_i32_0 = arith.constant 0 : i32
    return %arg0, %c0_i32 : i32, i32
  }
  func.func @transform_1(%arg0: i32) -> (i32, i32) {
    %c0_i32 = arith.constant 0 : i32
    %c0_i32_0 = arith.constant 0 : i32
    %c0_i32_1 = arith.constant 0 : i32
    return %c0_i32, %c0_i32_0 : i32, i32
  }
  func.func @transform_2(%arg0: i32) -> (i32, i32) {
    %c0_i32 = arith.constant 0 : i32
    %c0_i32_0 = arith.constant 0 : i32
    %c0_i32_1 = arith.constant 0 : i32
    return %c0_i32, %c0_i32_0 : i32, i32
  }
  func.func @transform_3(%arg0: i32) -> (i32, i32) {
    %c0_i32 = arith.constant 0 : i32
    %c0_i32_0 = arith.constant 0 : i32
    %c0_i32_1 = arith.constant 0 : i32
    return %c0_i32, %c0_i32_0 : i32, i32
  }
  func.func @transform_4(%arg0: i32) -> (i32, i32) {
    %c0_i32 = arith.constant 0 : i32
    %c0_i32_0 = arith.constant 0 : i32
    return %arg0, %c0_i32 : i32, i32
  }
}

</mosaic_0001>

<bundles_post_ra>
// kernel: tpu_custom_call.1
= control target key start
LH: loop header
LB: loop body
LE: loop exit
PB: predicated region body
PF: predicated region fallthrough
CT: control target
= control target key end

     0   :  { %9 = vsyncpa [#allocation3], 0  ;;  %s291_s0 = inlined_call_operand.hbm [shape: f32[8,16], index: 0, kind: input, shape index: {}]   ;;  %s292_s1 = inlined_call_operand.hbm [shape: f32[16,128], index: 1, kind: input, shape index: {}]   ;;  %s293_s2 = inlined_call_operand.vmem [shape: f32[1,128], index: 2, kind: input, shape index: {}]   ;;  %s294_s3 = inlined_call_operand.vmem [shape: f32[1,128], index: 3, kind: input, shape index: {}]   ;;  %s295_s4 = inlined_call_operand.vmem [shape: f32[8,1], index: 4, kind: output, shape index: {}]  }
   0x1   :  { %10 = vsyncpa [#allocation5], 0  ;;  %s219_s15 = smov [#allocation2]   ;;  %s220_s17 = smov [#allocation4]  }
   0x2   :  { %s17_s16 = sshll.u32 %s219_s15, 4  ;;  %s26_s18 = sshll.u32 %s220_s17, 4  ;;  %s18_s16 = int_to_ptr.vmem [resolvable:$true] %s17_s16  ;;  %s251_s18 = int_to_ptr.vmem [resolvable:$true] %s26_s18 }
   0x3   :  { %s171_s21 = scalar_lea.hbm %s291_s0, 128 }
   0x4   :  { %p172_p0 = scmp.ne.s32.totalorder %s291_s0, %s171_s21  ;;  %p175_p1 = scmp.lt.u32.totalorder %s171_s21, %s291_s0 }
   0x6   :  { %p177_p2 = pnand %p175_p1, %p172_p0 }
   0x8   :  { %180 = shalt.err (!%p177_p2)
}
   0x9   :  { %s181_s26 = scalar_lea.vmem %s18_s16, 128  ;;  %p186_p4 = scmp.lt.s32.totalorder %s18_s16, %s18_s16 }
   0xa   :  { %p182_p3 = scmp.ne.s32.totalorder %s18_s16, %s181_s26  ;;  %p187_p5 = scmp.lt.s32.totalorder %s181_s26, %s181_s26 }
   0xc   :  { %p188_p6 = por %p187_p5, %p186_p4 }
   0xe   :  { %p189_p7 = pnand %p188_p6, %p182_p3 }
  0x10   :  { %192 = shalt.err (!%p189_p7)
}
  0x11   :  { %20 = dma.hbm_to_vmem [thread:$0]  %s291_s0, 128, %s18_s16, [#allocation3]  }
  0x12   :  { %s193_s5 = scalar_lea.hbm %s292_s1, 256 }
  0x13   :  { %p194_p8 = scmp.ne.s32.totalorder %s292_s1, %s193_s5  ;;  %p197_p9 = scmp.lt.u32.totalorder %s193_s5, %s292_s1 }
  0x15   :  { %p199_p10 = pnand %p197_p9, %p194_p8 }
  0x17   :  { %202 = shalt.err (!%p199_p10)
}
  0x18   :  { %s203_s10 = scalar_lea.vmem %s251_s18, 256  ;;  %p208_p12 = scmp.lt.s32.totalorder %s251_s18, %s251_s18 }
  0x19   :  { %p204_p11 = scmp.ne.s32.totalorder %s251_s18, %s203_s10  ;;  %p209_p13 = scmp.lt.s32.totalorder %s203_s10, %s203_s10 }
  0x1b   :  { %p210_p0 = por %p209_p13, %p208_p12 }
  0x1d   :  { %p211_p1 = pnand %p210_p0, %p204_p11 }
  0x1f   :  { %214 = shalt.err (!%p211_p1)
}
  0x20   :  { %s221_s0 = smov 128   ;;  %s222_s11 = smov 8  }
  0x21   :  { %32 = dma.hbm_to_vmem [thread:$0]  %s292_s1, 256, %s251_s18, [#allocation5], %s221_s0, %s221_s0, %s222_s11  }
  0x22   :  { %215 = dma.done.wait [#allocation3], 128  }
  0x23   :  { %216 = vsyncadd [#allocation3], 4294967168 }
  0x24   :  { %217 = dma.done.wait [#allocation5], 256  }
  0x25   :  { %218 = vsyncadd [#allocation5], 4294967040  ;;  %v223_v0 = vmov 0.0|0.0   ;;  %vm224_vm0 = vmmov 0   ;;  %v225_v1 = vmov 0.0   ;;  %v44_v2 = vld [vmem:[#allocation4] sm:$0xff] }
  0x26   :  { %159 = vmatprep.subr.bf16.mxu0 %v223_v0  ;;  %156 = vmatprep.mubr.msk.f32.mxu0 %vm224_vm0, %v225_v1  ;;  %v45_v3 = vld [vmem:[#allocation4 + $0x8] sm:$0xff]  ;;  %v43_v5 = vld [vmem:[#allocation2] sm:$0xff]  ;;  %vm53_vm1 = vcmask 130048   ;;  %v146_v6 = vld [vmem:[%s293_s2] ss:$0 sm:$0xff]  ;;  %vm138_vm2 = vcmask 7168  }
  0x27   :  { %v160_v4 = vpack.c.bf16 %v45_v3, %v44_v2  ;;  %v148_v10 = vld [vmem:[%s294_s3] ss:$0 sm:$0xff] }
  0x29   :  { %161 = vmatpush3.bf16.msra.mxu0 %v160_v4 }
  0x2c   :  { %157 = vmatmul.mubr.msk.f32.vlgmr.msra.gmra.mrb[0].mxu0 %vm53_vm1, %v43_v5 }
  0xff   :  { %v123_v7 = vpop.f32.mrb[0].mxu0 }
 0x100   :  { %v124_v8 = vadd.f32 %v146_v6, %v123_v7  ;;  %v158_v9 = vpop.f32.mrb[1].mxu0 }
 0x102   :  { %169 = vtanh.f32 %v124_v8 }
 0x10c   :  { %v170_v11 = vpop.eup %169 }
 0x10d   :  { %v135_v12 = vmul.f32 %v170_v11, %v148_v10 }
 0x10f   :  { %136 = vadd.xlane.f32.xlu0 %v135_v12 }
 0x19c   :  { %v137_v13 = vpop.xlane.xlu0 %136 }
 0x19d   :  { %139 = vst.msk [vmem:[%s295_s4] sm:$0xff] %vm138_vm2, %v137_v13 }
 0x19e   :  { %144 = vsyncpa [#allocation3], 1 }
 0x19f   :  { %145 = vsyncpa [#allocation5], 1 }

</bundles_post_ra>
